<compile_context>
chip_gen: v7x
topology: tpu7x:2x2x1
jax: 0.10.0
libtpu: 0.0.40
codegen_flags: <defaults>
</compile_context>

<pallas_src>
import jax
import jax.numpy as jnp
from jax.experimental import pallas as pl
from jax.experimental.pallas import tpu as pltpu


def _folded_affine_kernel(w_ref, x_ref, o_ref):
    # w_ref: SMEM (3,) folded weights (scalar reads).
    # x_ref: VMEM (3, BR, BC) block of packed, feature-major input.
    # o_ref: VMEM (BR, BC) sublane- and lane-dense output block.
    o_ref[...] = (w_ref[0] * x_ref[0]
                  + w_ref[1] * x_ref[1]
                  + w_ref[2] * x_ref[2])


def fold_weights(params):
    """Collapse param1 @ param2 @ param3 @ param4 into one (3,) vector."""
    w = (params["param1"] @ params["param2"] @ params["param3"]
         @ params["param4"])
    return w.reshape(-1).astype(jnp.float32)


def _fit_block(extent, want, step):
    """Largest multiple of `step`, <= min(want, extent), dividing `extent`."""
    blk = max(step, min(want, extent) - (min(want, extent) % step))
    while extent % blk:
        blk -= step
    return blk


def layer_with_param_forward_packed(x_packed, params, *,
                                    block_rows=512, block_cols=512):
    """Fast path: feature-major, batch-packed input.

    x_packed: (3, R, C) float32 with R % 8 == 0 and C % 128 == 0.
              Batch sample n lives at x_packed[:, n // C, n % C].
    Returns:  (R, C) float32 in the same batch packing (flatten row-major to
              recover the (R*C,) batch order) -- no relayout around the kernel.
    """
    f, r, c = x_packed.shape
    assert f == 3, "layer_with_param expects 3 input features"
    assert r % 8 == 0 and c % 128 == 0, "packed batch must be (8,128)-aligned"

    w = fold_weights(params)
    br = _fit_block(r, block_rows, 8)
    bc = _fit_block(c, block_cols, 128)

    return pl.pallas_call(
        _folded_affine_kernel,
        out_shape=jax.ShapeDtypeStruct((r, c), jnp.float32),
        grid=(r // br, c // bc),
        in_specs=[
            pl.BlockSpec(memory_space=pltpu.MemorySpace.SMEM),   # folded W (3,)
            pl.BlockSpec((3, br, bc), lambda i, j: (0, i, j)),   # x block
        ],
        out_specs=pl.BlockSpec((br, bc), lambda i, j: (i, j)),
        compiler_params=pltpu.CompilerParams(
            dimension_semantics=("parallel", "parallel")),
    )(w, x_packed.astype(jnp.float32))


def layer_with_param_forward(x, params, *, lane_width=512, block_rows=512):
    """Compatibility path for the module's natural (N, 3) layout -> (N, 1)."""
    # TODO(synk): this (N,3) -> (3,R,C) repack is a full extra HBM pass; produce
    # activations feature-major upstream and call the packed entry point instead.
    n, k = x.shape
    assert k == 3, "layer_with_param expects 3 input features"

    c = lane_width
    while c > 128 and n < c * 8:          # shrink lane width for tiny batches
        c //= 2
    r = pl.cdiv(n, c)
    br = min(block_rows, pl.cdiv(r, 8) * 8)
    r = pl.cdiv(r, br) * br               # rows padded to a whole block count

    x_packed = (jnp.zeros((3, r * c), jnp.float32)
                .at[:, :n].set(x.astype(jnp.float32).T)
                .reshape(3, r, c))
    out_packed = layer_with_param_forward_packed(
        x_packed, params, block_rows=br, block_cols=c)
    # Keep the module's (N, 1) output contract on this compat path.
    return out_packed.reshape(-1)[:n].reshape(n, 1)


def init_params(key):
    """Deterministic stand-in for the torch.randn parameter init."""
    k1, k2, k3, k4 = jax.random.split(key, 4)
    return {
        "param1": jax.random.normal(k1, (3, 3), jnp.float32),
        "param2": jax.random.normal(k2, (3, 3), jnp.float32),
        "param3": jax.random.normal(k3, (3, 2), jnp.float32),
        "param4": jax.random.normal(k4, (2, 1), jnp.float32),
    }


def _reference(x, params):
    out = x.astype(jnp.float32)
    for key in ("param1", "param2", "param3", "param4"):
        out = out @ params[key].astype(jnp.float32)
    return out


if __name__ == "__main__":
    key = jax.random.PRNGKey(0)
    pkey, k_small, k_pad, k_packed = jax.random.split(key, 4)
    params = init_params(pkey)

    # 1) Compat path, small batch (N=8, 3 features as param1 requires).
    x_small = jax.random.normal(k_small, (8, 3), jnp.float32)
    out_small = jax.block_until_ready(layer_with_param_forward(x_small, params))
    assert out_small.shape == (8, 1)
    assert jnp.allclose(out_small, _reference(x_small, params),
                        atol=1e-4, rtol=1e-4)

    # 2) Compat path exercising zero-padding of a non-aligned batch.
    x_pad = jax.random.normal(k_pad, (300, 3), jnp.float32)
    out_pad = jax.block_until_ready(layer_with_param_forward(x_pad, params))
    assert out_pad.shape == (300, 1)
    assert jnp.allclose(out_pad, _reference(x_pad, params),
                        atol=1e-4, rtol=1e-4)

    # 3) Packed fast path with a multi-block 2-D grid (2 x 2 blocks).
    x_packed = jax.random.normal(k_packed, (3, 16, 256), jnp.float32)
    out_packed = jax.block_until_ready(
        layer_with_param_forward_packed(x_packed, params,
                                        block_rows=8, block_cols=128))
    assert out_packed.shape == (16, 256)
    ref_packed = _reference(x_packed.reshape(3, -1).T, params).reshape(16, 256)
    assert jnp.allclose(out_packed, ref_packed, atol=1e-4, rtol=1e-4)

    print("KERNEL_OK")
</pallas_src>

<mosaic_0001>
module attributes {stable_mosaic.version = 11 : i64} {
  func.func @_folded_affine_kernel(%arg0: i32, %arg1: i32, %arg2: memref<3xf32, #tpu.memory_space<smem>>, %arg3: memref<3x8x128xf32, #tpu.memory_space<vmem>>, %arg4: memref<8x128xf32, #tpu.memory_space<vmem>>) attributes {dimension_semantics = [#tpu.dimension_semantics<parallel>, #tpu.dimension_semantics<parallel>], iteration_bounds = array<i64: 1, 1>, scalar_prefetch = 0 : i64, scratch_operands = 0 : i64, tpu.core_type = #tpu.core_type<tc>, window_params = [{transform_indices = @transform_0, window_bounds = array<i64: 3>}, {transform_indices = @transform_1, window_bounds = array<i64: 3, 8, 128>}, {transform_indices = @transform_2, window_bounds = array<i64: 8, 128>}]} {
    %c0 = arith.constant 0 : index
    %0 = memref.load %arg2[%c0] : memref<3xf32, #tpu.memory_space<smem>>
    %c0_0 = arith.constant 0 : index
    %c0_1 = arith.constant 0 : index
    %c0_2 = arith.constant 0 : index
    %1 = vector.load %arg3[%c0_0, %c0_1, %c0_2] : memref<3x8x128xf32, #tpu.memory_space<vmem>>, vector<1x8x128xf32>
    %2 = vector.shape_cast %1 : vector<1x8x128xf32> to vector<8x128xf32>
    %3 = vector.broadcast %0 : f32 to vector<8x128xf32>
    %4 = arith.mulf %3, %2 : vector<8x128xf32>
    %c1 = arith.constant 1 : index
    %5 = memref.load %arg2[%c1] : memref<3xf32, #tpu.memory_space<smem>>
    %c1_3 = arith.constant 1 : index
    %c0_4 = arith.constant 0 : index
    %c0_5 = arith.constant 0 : index
    %6 = vector.load %arg3[%c1_3, %c0_4, %c0_5] : memref<3x8x128xf32, #tpu.memory_space<vmem>>, vector<1x8x128xf32>
    %7 = vector.shape_cast %6 : vector<1x8x128xf32> to vector<8x128xf32>
    %8 = vector.broadcast %5 : f32 to vector<8x128xf32>
    %9 = arith.mulf %8, %7 : vector<8x128xf32>
    %10 = arith.addf %4, %9 : vector<8x128xf32>
    %c2 = arith.constant 2 : index
    %11 = memref.load %arg2[%c2] : memref<3xf32, #tpu.memory_space<smem>>
    %c2_6 = arith.constant 2 : index
    %c0_7 = arith.constant 0 : index
    %c0_8 = arith.constant 0 : index
    %12 = vector.load %arg3[%c2_6, %c0_7, %c0_8] : memref<3x8x128xf32, #tpu.memory_space<vmem>>, vector<1x8x128xf32>
    %13 = vector.shape_cast %12 : vector<1x8x128xf32> to vector<8x128xf32>
    %14 = vector.broadcast %11 : f32 to vector<8x128xf32>
    %15 = arith.mulf %14, %13 : vector<8x128xf32>
    %16 = arith.addf %10, %15 : vector<8x128xf32>
    %c0_9 = arith.constant 0 : index
    %c0_10 = arith.constant 0 : index
    %17 = vector.load %arg4[%c0_9, %c0_10] : memref<8x128xf32, #tpu.memory_space<vmem>>, vector<8x128xf32>
    tpu.vector_store %arg4[%c0_9, %c0_10], %16 {strides = array<i32>} : memref<8x128xf32, #tpu.memory_space<vmem>>, vector<8x128xf32>,
    return
  }
  func.func @transform_0(%arg0: i32, %arg1: i32) -> i32 {
    %c0_i32 = arith.constant 0 : i32
    %c0_i32_0 = arith.constant 0 : i32
    return %c0_i32 : i32
  }
  func.func @transform_1(%arg0: i32, %arg1: i32) -> (i32, i32, i32) {
    %c0_i32 = arith.constant 0 : i32
    %c0_i32_0 = arith.constant 0 : i32
    return %c0_i32, %arg0, %arg1 : i32, i32, i32
  }
  func.func @transform_2(%arg0: i32, %arg1: i32) -> (i32, i32) {
    %c0_i32 = arith.constant 0 : i32
    return %arg0, %arg1 : i32, i32
  }
}

</mosaic_0001>

<bundles_post_ra>
// kernel: tpu_custom_call.1
= control target key start
LH: loop header
LB: loop body
LE: loop exit
PB: predicated region body
PF: predicated region fallthrough
CT: control target
= control target key end

     0   :  { %7 = vsyncpa [#allocation5], 0  ;;  %s193_s0 = inlined_call_operand.hbm [shape: f32[3], index: 0, kind: input, shape index: {}]   ;;  %s194_s1 = inlined_call_operand.hbm [shape: f32[3,8,128], index: 1, kind: input, shape index: {}]   ;;  %s195_s2 = inlined_call_operand.hbm [shape: f32[8,128], index: 2, kind: output, shape index: {}]  }
   0x1   :  { %8 = vsyncpa [#allocation3], 0 }
   0x2   :  { %9 = vsyncpa [#allocation4], 0  ;;  %s77_s11 = scalar_lea.hbm %s193_s0, 16 }
   0x3   :  { %p78_p0 = scmp.ne.s32.totalorder %s193_s0, %s77_s11  ;;  %p81_p1 = scmp.lt.u32.totalorder %s77_s11, %s193_s0 }
   0x5   :  { %p83_p2 = pnand %p81_p1, %p78_p0 }
   0x7   :  { %86 = shalt.err (!%p83_p2)
}
   0x8   :  { %s137_s16 = smov [#allocation2]   ;;  %s138_s19 = smov [#allocation6]  }
   0x9   :  { %17 = dma.hbm_to_smem %s193_s0, 16, %s137_s16, [#allocation5]  }
   0xa   :  { %s23_s20 = sshll.u32 %s138_s19, 4  ;;  %s87_s23 = scalar_lea.hbm %s194_s1, 384  ;;  %s24_s20 = int_to_ptr.vmem [resolvable:$true] %s23_s20 }
   0xb   :  { %p88_p3 = scmp.ne.s32.totalorder %s194_s1, %s87_s23  ;;  %p91_p4 = scmp.lt.u32.totalorder %s87_s23, %s194_s1 }
   0xd   :  { %p93_p5 = pnand %p91_p4, %p88_p3 }
   0xf   :  { %96 = shalt.err (!%p93_p5)
}
  0x10   :  { %s97_s28 = scalar_lea.vmem %s24_s20, 384  ;;  %p102_p7 = scmp.lt.s32.totalorder %s24_s20, %s24_s20 }
  0x11   :  { %p98_p6 = scmp.ne.s32.totalorder %s24_s20, %s97_s28  ;;  %p103_p8 = scmp.lt.s32.totalorder %s97_s28, %s97_s28 }
  0x13   :  { %p104_p9 = por %p103_p8, %p102_p7 }
  0x15   :  { %p105_p10 = pnand %p104_p9, %p98_p6 }
  0x17   :  { %108 = shalt.err (!%p105_p10)
}
  0x18   :  { %s139_s0 = smov 128   ;;  %s140_s29 = smov 8  }
  0x19   :  { %29 = dma.hbm_to_vmem [thread:$0]  %s194_s1, 384, %s24_s20, [#allocation3], %s139_s0, %s139_s0, %s140_s29  }
  0x1a   :  { %131 = dma.done.wait [#allocation5], 16  }
  0x1b   :  { %132 = vsyncadd [#allocation5], 4294967280 }
  0x1c   :  { %133 = dma.done.wait [#allocation3], 384  }
  0x1d   :  { %134 = vsyncadd [#allocation3], 4294966912 }
  0x1e   :  { %36 = sfence }
  0x1f   :  { %s37_s4 = sld [smem:[#allocation2]]  ;;  %s70_s5 = sld [smem:[#allocation2 + $0x1]]  ;;  %v38_v0 = vld [vmem:[#allocation6] sm:$0xff]  ;;  %v43_v1 = vld [vmem:[#allocation6 + $0x8] sm:$0xff]  ;;  %v49_v2 = vld [vmem:[#allocation6 + $0x10] sm:$0xff] }
  0x20   :  { %s71_s6 = sld [smem:[#allocation2 + $0x2]]  ;;  %s141_s7 = smov [#allocation7]  }
  0x21   :  { %s60_s8 = sshll.u32 %s141_s7, 4  ;;  %s61_s8 = int_to_ptr.vmem [resolvable:$true] %s60_s8 }
  0x22   :  { %s109_s1 = scalar_lea.vmem %s61_s8, 128  ;;  %p114_p12 = scmp.lt.s32.totalorder %s61_s8, %s61_s8 }
  0x23   :  { %p110_p11 = scmp.ne.s32.totalorder %s61_s8, %s109_s1  ;;  %p115_p13 = scmp.lt.s32.totalorder %s109_s1, %s109_s1 }
  0x25   :  { %v39_v3 = vstv %s37_s4  ;;  %v44_v4 = vstv %s70_s5  ;;  %p116_p0 = por %p115_p13, %p114_p12 }
  0x26   :  { %v40_v5 = vmul.f32 %v39_v3, %v38_v0  ;;  %v45_v6 = vmul.f32 %v44_v4, %v43_v1  ;;  %v50_v7 = vstv %s71_s6 }
  0x27   :  { %v51_v8 = vmul.f32 %v50_v7, %v49_v2  ;;  %p117_p1 = pnand %p116_p0, %p110_p11 }
  0x28   :  { %v46_v9 = vadd.f32 %v45_v6, %v40_v5 }
  0x2a   :  { %v52_v10 = vadd.f32 %v51_v8, %v46_v9 }
  0x2c   :  { %53 = vst [vmem:[#allocation7] sm:$0xff] %v52_v10 }
  0x2d   :  { %120 = shalt.err (!%p117_p1)
}
  0x2e   :  { %s121_s11 = scalar_lea.hbm %s195_s2, 128 }
  0x2f   :  { %p122_p2 = scmp.ne.s32.totalorder %s195_s2, %s121_s11  ;;  %p125_p3 = scmp.lt.u32.totalorder %s121_s11, %s195_s2 }
  0x31   :  { %p127_p4 = pnand %p125_p3, %p122_p2 }
  0x33   :  { %130 = shalt.err (!%p127_p4)
}
  0x34   :  { %63 = dma.vmem_to_hbm [thread:$0]  %s61_s8, 128, %s195_s2, [#allocation4]  }
  0x35   :  { %135 = dma.done.wait [#allocation4], 128  }
  0x36   :  { %136 = vsyncadd [#allocation4], 4294967168 }
  0x37   :  { %67 = vsyncpa [#allocation3], 1 }
  0x38   :  { %68 = vsyncpa [#allocation4], 1 }
  0x39   :  { %69 = vsyncpa [#allocation5], 1 }

</bundles_post_ra>
